<compile_context>
chip_gen: v7x
topology: tpu7x:2x2x1
jax: 0.10.0
libtpu: 0.0.40
codegen_flags: <defaults>
</compile_context>

<pallas_src>
import numpy as np
import jax
import jax.numpy as jnp
from jax.experimental import pallas as pl
from jax.experimental.pallas import tpu as pltpu

NUM_CLASSES = 5
CHANS = 61        # matches nn.Conv1d(Chans, 32, ...) default Chans=61
SAMPLES = 128     # small stand-in for Samples=5120 (must be divisible by 16)
BATCH = 2
BN_EPS = 1e-5


# ----------------------------------------------------------------------------
# The Pallas kernel: full forward pass for one batch element.
# ----------------------------------------------------------------------------
def _cnn1d_kernel(x_ref,
                  w1_ref, t1_ref,
                  w2_ref, t2_ref,
                  w3_ref, t3_ref,
                  fcw_ref, fcb_ref,
                  out_ref,
                  a1_ref, a2_ref):
    f32, bf16 = jnp.float32, jnp.bfloat16

    lp, cin = x_ref.shape            # (L + 6, C_in_pad): conv-1 pad=3 done host-side
    l1 = (lp - 6) // 2               # after conv1 (stride 2)
    l2 = l1 // 4                     # after pool1 + conv2 (stride 2)
    l3 = l2 // 2                     # after pool2 + conv3 (stride 1)
    c1 = w1_ref.shape[1]             # 32
    c2 = w2_ref.shape[1]             # 64
    k1 = w1_ref.shape[0] // cin      # 7
    k2 = w2_ref.shape[0] // c1       # 5
    k3 = w3_ref.shape[0] // c2       # 3

    def conv_shift_relu(taps, w_ref, t_ref):
        # One wide-contraction bf16 MXU matmul per layer (im2col along lanes).
        # BN scale is pre-folded into w_ref; shift = (bias - mean)*scale + beta.
        patches = jnp.concatenate(taps, axis=-1).astype(bf16)       # (L_out, K*C_in)
        y = jnp.dot(patches, w_ref[...], preferred_element_type=f32)
        return jnp.maximum(y + t_ref[...], 0.0)                     # f32 on VPU

    # ---- Conv1: k=7, s=2, p=3.  Tap k reads x_pad rows k, k+2, k+4, ...
    taps1 = [x_ref[pl.ds(k, l1, stride=2), :] for k in range(k1)]
    h1 = conv_shift_relu(taps1, w1_ref, t1_ref)                      # (l1, 32) f32

    # Stash with 8-row zero pads so MaxPool(2) + conv-2 padding become plain reads.
    # (Padding rows are re-zeroed every grid step: scratch persists per core and
    #  a first-step-only init breaks under megacore grid sharding.)
    zpad1 = jnp.zeros((8, c1), f32)
    a1_ref[0:8, :] = zpad1
    a1_ref[8:8 + l1, :] = h1
    a1_ref[8 + l1:16 + l1, :] = zpad1

    # ---- MaxPool1d(2) fused into Conv2 (k=5, s=2, p=2):
    #      tap k = max(even, odd) row pairs read at stride 4.
    taps2 = [jnp.maximum(a1_ref[pl.ds(2 * k + 4, l2, stride=4), :],
                         a1_ref[pl.ds(2 * k + 5, l2, stride=4), :])
             for k in range(k2)]
    h2 = conv_shift_relu(taps2, w2_ref, t2_ref)                      # (l2, 64) f32

    zpad2 = jnp.zeros((8, c2), f32)
    a2_ref[0:8, :] = zpad2
    a2_ref[8:8 + l2, :] = h2
    a2_ref[8 + l2:16 + l2, :] = zpad2

    # ---- MaxPool1d(2) fused into Conv3 (k=3, s=1, p=1): pairs read at stride 2.
    taps3 = [jnp.maximum(a2_ref[pl.ds(2 * k + 6, l3, stride=2), :],
                         a2_ref[pl.ds(2 * k + 7, l3, stride=2), :])
             for k in range(k3)]
    h3 = conv_shift_relu(taps3, w3_ref, t3_ref)                      # (l3, 128) f32

    # ---- AdaptiveAvgPool1d(1) + Linear (logits padded to 128 lanes -> dense store)
    feat = jnp.mean(h3, axis=0, keepdims=True)                       # (1, 128) f32
    out_ref[...] = jnp.dot(feat, fcw_ref[...],
                           preferred_element_type=f32) + fcb_ref[...]


# ----------------------------------------------------------------------------
# Wrapper: parameter folding / layout plumbing + pallas_call.
# ----------------------------------------------------------------------------
def _fold_bn(gamma, beta, mean, var, conv_bias):
    scale = gamma / jnp.sqrt(var + BN_EPS)                  # (C_out,)
    shift = (conv_bias - mean) * scale + beta               # (C_out,)
    return scale, shift.reshape(1, -1)


def _im2col_weight(w, scale, cin_pad):
    # (C_out, C_in, K) with per-C_out BN scale folded in
    #   -> (K*C_in_pad, C_out) bf16, matching the kernel's lane-concat tap order.
    c_out, c_in, k = w.shape
    ws = w * scale[:, None, None]                           # fold BN scale (f32)
    wt = jnp.transpose(ws, (2, 1, 0))                       # (K, C_in, C_out)
    wt = jnp.pad(wt, ((0, 0), (0, cin_pad - c_in), (0, 0)))
    return wt.reshape(k * cin_pad, c_out).astype(jnp.bfloat16)


def cnn1d_forward(x, p):
    n, chans, l_in = x.shape
    if l_in % 16 != 0:
        raise ValueError("Samples must be divisible by 16 (two stride-2 convs + two pools)")
    num_classes = p["fcw"].shape[0]
    c_pad = ((chans + 7) // 8) * 8        # 61 -> 64
    cls_pad = 128                         # lane-dense logits
    l1, l2 = l_in // 2, l_in // 8
    c1, c2 = p["w1"].shape[0], p["w2"].shape[0]   # 32, 64

    # Input NCL -> (N, L+6, C_pad): conv-1 "padding=3" zeros and channel pad here.
    xt = jnp.transpose(x.astype(jnp.float32), (0, 2, 1))
    xt = jnp.pad(xt, ((0, 0), (3, 3), (0, c_pad - chans)))

    s1, t1 = _fold_bn(p["bn1_gamma"], p["bn1_beta"], p["bn1_mean"], p["bn1_var"], p["b1"])
    s2, t2 = _fold_bn(p["bn2_gamma"], p["bn2_beta"], p["bn2_mean"], p["bn2_var"], p["b2"])
    s3, t3 = _fold_bn(p["bn3_gamma"], p["bn3_beta"], p["bn3_mean"], p["bn3_var"], p["b3"])

    w1m = _im2col_weight(p["w1"], s1, c_pad)
    w2m = _im2col_weight(p["w2"], s2, p["w2"].shape[1])
    w3m = _im2col_weight(p["w3"], s3, p["w3"].shape[1])

    fcw = jnp.pad(p["fcw"].T, ((0, 0), (0, cls_pad - num_classes)))        # (128, 128)
    fcb = jnp.pad(p["fcb"], (0, cls_pad - num_classes)).reshape(1, cls_pad)

    operands = (xt, w1m, t1, w2m, t2, w3m, t3, fcw, fcb)

    in_specs = [pl.BlockSpec((None, l_in + 6, c_pad), lambda b: (b, 0, 0))]
    in_specs += [pl.BlockSpec(a.shape, lambda b: (0, 0)) for a in operands[1:]]

    out = pl.pallas_call(
        _cnn1d_kernel,
        out_shape=jax.ShapeDtypeStruct((n, 1, cls_pad), jnp.float32),
        grid_spec=pltpu.PrefetchScalarGridSpec(
            num_scalar_prefetch=0,
            grid=(n,),
            in_specs=in_specs,
            out_specs=pl.BlockSpec((None, 1, cls_pad), lambda b: (b, 0, 0)),
            scratch_shapes=[pltpu.VMEM((l1 + 16, c1), jnp.float32),   # conv1 out, zero-padded
                            pltpu.VMEM((l2 + 16, c2), jnp.float32)],  # conv2 out, zero-padded
        ),
        compiler_params=pltpu.CompilerParams(dimension_semantics=("parallel",)),
    )(*operands)
    return out[:, 0, :num_classes]   # (N, num_classes), matches PyTorch output


# ----------------------------------------------------------------------------
# Deterministic parameter init (synthetic; shapes from CNN1D.__init__).
# ----------------------------------------------------------------------------
def init_params(key, num_classes=NUM_CLASSES, chans=CHANS):
    keys = iter(jax.random.split(key, 24))

    def nrm(shape, scale=0.1):
        return scale * jax.random.normal(next(keys), shape, dtype=jnp.float32)

    def uni(shape):
        return 0.5 + jax.random.uniform(next(keys), shape, dtype=jnp.float32)

    p = {}
    p["w1"], p["b1"] = nrm((32, chans, 7)), nrm((32,))
    p["w2"], p["b2"] = nrm((64, 32, 5)), nrm((64,))
    p["w3"], p["b3"] = nrm((128, 64, 3)), nrm((128,))
    for i, c in ((1, 32), (2, 64), (3, 128)):
        p[f"bn{i}_gamma"] = uni((c,))
        p[f"bn{i}_beta"] = nrm((c,))
        p[f"bn{i}_mean"] = nrm((c,))
        p[f"bn{i}_var"] = uni((c,))
    p["fcw"] = nrm((num_classes, 128))
    p["fcb"] = nrm((num_classes,))
    return p


# ----------------------------------------------------------------------------
# Pure-JAX reference (mirrors PyTorch eval-mode forward).  With
# match_kernel_precision=True the BN scale is folded into the weights before
# the bf16 cast and the conv inputs are cast to bf16 (f32 accumulation), so it
# matches the kernel's MXU precision up to accumulation order.
# ----------------------------------------------------------------------------
def cnn1d_reference(x, p, match_kernel_precision=False):
    def conv1d(h, w, stride, pad):
        return jax.lax.conv_general_dilated(
            h, w, window_strides=(stride,), padding=[(pad, pad)],
            dimension_numbers=("NCH", "OIH", "NCH"),
            preferred_element_type=jnp.float32)

    def layer(h, w, b, g, beta, mean, var, stride, pad):
        scale = g / jnp.sqrt(var + BN_EPS)
        shift = (b - mean) * scale + beta
        if match_kernel_precision:
            y = conv1d(h.astype(jnp.bfloat16),
                       (w * scale[:, None, None]).astype(jnp.bfloat16),
                       stride, pad)
            y = y + shift[None, :, None]
        else:
            y = conv1d(h, w, stride, pad) + b[None, :, None]
            y = (y - mean[None, :, None]) * scale[None, :, None] + beta[None, :, None]
        return jax.nn.relu(y)

    def maxpool2(h):
        n, c, l = h.shape
        return h.reshape(n, c, l // 2, 2).max(axis=-1)

    h = layer(x, p["w1"], p["b1"], p["bn1_gamma"], p["bn1_beta"],
              p["bn1_mean"], p["bn1_var"], 2, 3)
    h = maxpool2(h)
    h = layer(h, p["w2"], p["b2"], p["bn2_gamma"], p["bn2_beta"],
              p["bn2_mean"], p["bn2_var"], 2, 2)
    h = maxpool2(h)
    h = layer(h, p["w3"], p["b3"], p["bn3_gamma"], p["bn3_beta"],
              p["bn3_mean"], p["bn3_var"], 1, 1)
    feat = h.mean(axis=-1)
    return feat @ p["fcw"].T + p["fcb"][None, :]


if __name__ == "__main__":
    key = jax.random.PRNGKey(0)
    kx, kp = jax.random.split(key)
    x = jax.random.normal(kx, (BATCH, CHANS, SAMPLES), dtype=jnp.float32)
    params = init_params(kp)

    out = jax.block_until_ready(cnn1d_forward(x, params))
    assert out.shape == (BATCH, NUM_CLASSES), out.shape
    out_np = np.asarray(out)

    # Tight check vs a reference that matches the kernel's precision choices
    # (BN scale folded into bf16 weights, bf16 inputs, f32 accumulation).
    ref_bf16 = np.asarray(jax.block_until_ready(
        cnn1d_reference(x, params, match_kernel_precision=True)))
    if not np.allclose(out_np, ref_bf16, atol=2e-2, rtol=2e-2):
        raise AssertionError(f"mismatch vs bf16-matched reference:\n{out_np}\n{ref_bf16}")

    # Loose check vs the full-f32 PyTorch-fidelity reference (bf16 rounding budget).
    ref_f32 = np.asarray(jax.block_until_ready(
        cnn1d_reference(x, params, match_kernel_precision=False)))
    if not np.allclose(out_np, ref_f32, atol=2e-1, rtol=1e-1):
        raise AssertionError(f"mismatch vs f32 reference:\n{out_np}\n{ref_f32}")

    print("KERNEL_OK")
</pallas_src>

<mosaic_0001>
module attributes {stable_mosaic.version = 11 : i64} {
  func.func @_cnn1d_kernel(%arg0: i32, %arg1: memref<1x134x64xf32, #tpu.memory_space<vmem>>, %arg2: memref<448x32xbf16, #tpu.memory_space<vmem>>, %arg3: memref<1x32xf32, #tpu.memory_space<vmem>>, %arg4: memref<160x64xbf16, #tpu.memory_space<vmem>>, %arg5: memref<1x64xf32, #tpu.memory_space<vmem>>, %arg6: memref<192x128xbf16, #tpu.memory_space<vmem>>, %arg7: memref<1x128xf32, #tpu.memory_space<vmem>>, %arg8: memref<128x128xf32, #tpu.memory_space<vmem>>, %arg9: memref<1x128xf32, #tpu.memory_space<vmem>>, %arg10: memref<1x1x128xf32, #tpu.memory_space<vmem>>, %arg11: memref<80x32xf32, #tpu.memory_space<vmem>>, %arg12: memref<32x64xf32, #tpu.memory_space<vmem>>) attributes {dimension_semantics = [#tpu.dimension_semantics<parallel>], iteration_bounds = array<i64: 2>, scalar_prefetch = 0 : i64, scratch_operands = 2 : i64, tpu.core_type = #tpu.core_type<tc>, window_params = [{transform_indices = @transform_0, window_bounds = array<i64: 1, 134, 64>}, {pipeline_mode = #tpu.pipeline_mode<synchronous>, transform_indices = @transform_1, window_bounds = array<i64: 448, 32>}, {pipeline_mode = #tpu.pipeline_mode<synchronous>, transform_indices = @transform_2, window_bounds = array<i64: 1, 32>}, {pipeline_mode = #tpu.pipeline_mode<synchronous>, transform_indices = @transform_3, window_bounds = array<i64: 160, 64>}, {pipeline_mode = #tpu.pipeline_mode<synchronous>, transform_indices = @transform_4, window_bounds = array<i64: 1, 64>}, {pipeline_mode = #tpu.pipeline_mode<synchronous>, transform_indices = @transform_5, window_bounds = array<i64: 192, 128>}, {pipeline_mode = #tpu.pipeline_mode<synchronous>, transform_indices = @transform_6, window_bounds = array<i64: 1, 128>}, {pipeline_mode = #tpu.pipeline_mode<synchronous>, transform_indices = @transform_7, window_bounds = array<i64: 128, 128>}, {pipeline_mode = #tpu.pipeline_mode<synchronous>, transform_indices = @transform_8, window_bounds = array<i64: 1, 128>}, {transform_indices = @transform_9, window_bounds = array<i64: 1, 1, 128>}]} {
    %c0 = arith.constant 0 : index
    %c0_0 = arith.constant 0 : index
    %c0_1 = arith.constant 0 : index
    %0 = tpu.strided_load %arg1[%c0, %c0_0, %c0_1] {strides = array<i32: 1, 2, 1>} : memref<1x134x64xf32, #tpu.memory_space<vmem>>, vector<1x64x64xf32>
    %1 = vector.shape_cast %0 : vector<1x64x64xf32> to vector<64x64xf32>
    %c0_2 = arith.constant 0 : index
    %c1 = arith.constant 1 : index
    %c0_3 = arith.constant 0 : index
    %2 = tpu.strided_load %arg1[%c0_2, %c1, %c0_3] {strides = array<i32: 1, 2, 1>} : memref<1x134x64xf32, #tpu.memory_space<vmem>>, vector<1x64x64xf32>
    %3 = vector.shape_cast %2 : vector<1x64x64xf32> to vector<64x64xf32>
    %c0_4 = arith.constant 0 : index
    %c2 = arith.constant 2 : index
    %c0_5 = arith.constant 0 : index
    %4 = tpu.strided_load %arg1[%c0_4, %c2, %c0_5] {strides = array<i32: 1, 2, 1>} : memref<1x134x64xf32, #tpu.memory_space<vmem>>, vector<1x64x64xf32>
    %5 = vector.shape_cast %4 : vector<1x64x64xf32> to vector<64x64xf32>
    %c0_6 = arith.constant 0 : index
    %c3 = arith.constant 3 : index
    %c0_7 = arith.constant 0 : index
    %6 = tpu.strided_load %arg1[%c0_6, %c3, %c0_7] {strides = array<i32: 1, 2, 1>} : memref<1x134x64xf32, #tpu.memory_space<vmem>>, vector<1x64x64xf32>
    %7 = vector.shape_cast %6 : vector<1x64x64xf32> to vector<64x64xf32>
    %c0_8 = arith.constant 0 : index
    %c4 = arith.constant 4 : index
    %c0_9 = arith.constant 0 : index
    %8 = tpu.strided_load %arg1[%c0_8, %c4, %c0_9] {strides = array<i32: 1, 2, 1>} : memref<1x134x64xf32, #tpu.memory_space<vmem>>, vector<1x64x64xf32>
    %9 = vector.shape_cast %8 : vector<1x64x64xf32> to vector<64x64xf32>
    %c0_10 = arith.constant 0 : index
    %c5 = arith.constant 5 : index
    %c0_11 = arith.constant 0 : index
    %10 = tpu.strided_load %arg1[%c0_10, %c5, %c0_11] {strides = array<i32: 1, 2, 1>} : memref<1x134x64xf32, #tpu.memory_space<vmem>>, vector<1x64x64xf32>
    %11 = vector.shape_cast %10 : vector<1x64x64xf32> to vector<64x64xf32>
    %c0_12 = arith.constant 0 : index
    %c6 = arith.constant 6 : index
    %c0_13 = arith.constant 0 : index
    %12 = tpu.strided_load %arg1[%c0_12, %c6, %c0_13] {strides = array<i32: 1, 2, 1>} : memref<1x134x64xf32, #tpu.memory_space<vmem>>, vector<1x64x64xf32>
    %13 = vector.shape_cast %12 : vector<1x64x64xf32> to vector<64x64xf32>
    %14 = tpu.concatenate %1, %3, %5, %7, %9, %11, %13 in 1 : vector<64x64xf32>, vector<64x64xf32>, vector<64x64xf32>, vector<64x64xf32>, vector<64x64xf32>, vector<64x64xf32>, vector<64x64xf32> -> vector<64x448xf32>
    %15 = arith.truncf %14 : vector<64x448xf32> to vector<64x448xbf16>
    %c0_14 = arith.constant 0 : index
    %c0_15 = arith.constant 0 : index
    %16 = vector.load %arg2[%c0_14, %c0_15] : memref<448x32xbf16, #tpu.memory_space<vmem>>, vector<448x32xbf16>
    %cst = arith.constant dense<0.000000e+00> : vector<64x32xf32>
    %17 = tpu.matmul %15, %16, %cst {dimension_numbers = #tpu.dot_dimension_numbers<[1], [0], [0], [1], [0, 0, 1, 1], [], []>} : vector<64x448xbf16>, vector<448x32xbf16>, vector<64x32xf32> -> vector<64x32xf32>
    %c0_16 = arith.constant 0 : index
    %c0_17 = arith.constant 0 : index
    %18 = vector.load %arg3[%c0_16, %c0_17] : memref<1x32xf32, #tpu.memory_space<vmem>>, vector<1x32xf32>
    %19 = vector.broadcast %18 : vector<1x32xf32> to vector<64x32xf32>
    %20 = arith.addf %17, %19 : vector<64x32xf32>
    %cst_18 = arith.constant 0.000000e+00 : f32
    %21 = vector.broadcast %cst_18 : f32 to vector<64x32xf32>
    %22 = arith.maximumf %20, %21 : vector<64x32xf32>
    %cst_19 = arith.constant 0.000000e+00 : f32
    %23 = vector.broadcast %cst_19 : f32 to vector<8x32xf32>
    %c0_20 = arith.constant 0 : index
    %c0_21 = arith.constant 0 : index
    %24 = vector.load %arg11[%c0_20, %c0_21] : memref<80x32xf32, #tpu.memory_space<vmem>>, vector<8x32xf32>
    tpu.vector_store %arg11[%c0_20, %c0_21], %23 {strides = array<i32>} : memref<80x32xf32, #tpu.memory_space<vmem>>, vector<8x32xf32>,
    %c8 = arith.constant 8 : index
    %c0_22 = arith.constant 0 : index
    %25 = vector.load %arg11[%c8, %c0_22] : memref<80x32xf32, #tpu.memory_space<vmem>>, vector<64x32xf32>
    tpu.vector_store %arg11[%c8, %c0_22], %22 {strides = array<i32>} : memref<80x32xf32, #tpu.memory_space<vmem>>, vector<64x32xf32>,
    %c72 = arith.constant 72 : index
    %c0_23 = arith.constant 0 : index
    %26 = vector.load %arg11[%c72, %c0_23] : memref<80x32xf32, #tpu.memory_space<vmem>>, vector<8x32xf32>
    tpu.vector_store %arg11[%c72, %c0_23], %23 {strides = array<i32>} : memref<80x32xf32, #tpu.memory_space<vmem>>, vector<8x32xf32>,
    %c4_24 = arith.constant 4 : index
    %c0_25 = arith.constant 0 : index
    %27 = tpu.strided_load %arg11[%c4_24, %c0_25] {strides = array<i32: 4, 1>} : memref<80x32xf32, #tpu.memory_space<vmem>>, vector<16x32xf32>
    %c5_26 = arith.constant 5 : index
    %c0_27 = arith.constant 0 : index
    %28 = tpu.strided_load %arg11[%c5_26, %c0_27] {strides = array<i32: 4, 1>} : memref<80x32xf32, #tpu.memory_space<vmem>>, vector<16x32xf32>
    %29 = arith.maximumf %27, %28 : vector<16x32xf32>
    %c6_28 = arith.constant 6 : index
    %c0_29 = arith.constant 0 : index
    %30 = tpu.strided_load %arg11[%c6_28, %c0_29] {strides = array<i32: 4, 1>} : memref<80x32xf32, #tpu.memory_space<vmem>>, vector<16x32xf32>
    %c7 = arith.constant 7 : index
    %c0_30 = arith.constant 0 : index
    %31 = tpu.strided_load %arg11[%c7, %c0_30] {strides = array<i32: 4, 1>} : memref<80x32xf32, #tpu.memory_space<vmem>>, vector<16x32xf32>
    %32 = arith.maximumf %30, %31 : vector<16x32xf32>
    %c8_31 = arith.constant 8 : index
    %c0_32 = arith.constant 0 : index
    %33 = tpu.strided_load %arg11[%c8_31, %c0_32] {strides = array<i32: 4, 1>} : memref<80x32xf32, #tpu.memory_space<vmem>>, vector<16x32xf32>
    %c9 = arith.constant 9 : index
    %c0_33 = arith.constant 0 : index
    %34 = tpu.strided_load %arg11[%c9, %c0_33] {strides = array<i32: 4, 1>} : memref<80x32xf32, #tpu.memory_space<vmem>>, vector<16x32xf32>
    %35 = arith.maximumf %33, %34 : vector<16x32xf32>
    %c10 = arith.constant 10 : index
    %c0_34 = arith.constant 0 : index
    %36 = tpu.strided_load %arg11[%c10, %c0_34] {strides = array<i32: 4, 1>} : memref<80x32xf32, #tpu.memory_space<vmem>>, vector<16x32xf32>
    %c11 = arith.constant 11 : index
    %c0_35 = arith.constant 0 : index
    %37 = tpu.strided_load %arg11[%c11, %c0_35] {strides = array<i32: 4, 1>} : memref<80x32xf32, #tpu.memory_space<vmem>>, vector<16x32xf32>
    %38 = arith.maximumf %36, %37 : vector<16x32xf32>
    %c12 = arith.constant 12 : index
    %c0_36 = arith.constant 0 : index
    %39 = tpu.strided_load %arg11[%c12, %c0_36] {strides = array<i32: 4, 1>} : memref<80x32xf32, #tpu.memory_space<vmem>>, vector<16x32xf32>
    %c13 = arith.constant 13 : index
    %c0_37 = arith.constant 0 : index
    %40 = tpu.strided_load %arg11[%c13, %c0_37] {strides = array<i32: 4, 1>} : memref<80x32xf32, #tpu.memory_space<vmem>>, vector<16x32xf32>
    %41 = arith.maximumf %39, %40 : vector<16x32xf32>
    %42 = tpu.concatenate %29, %32, %35, %38, %41 in 1 : vector<16x32xf32>, vector<16x32xf32>, vector<16x32xf32>, vector<16x32xf32>, vector<16x32xf32> -> vector<16x160xf32>
    %43 = arith.truncf %42 : vector<16x160xf32> to vector<16x160xbf16>
    %c0_38 = arith.constant 0 : index
    %c0_39 = arith.constant 0 : index
    %44 = vector.load %arg4[%c0_38, %c0_39] : memref<160x64xbf16, #tpu.memory_space<vmem>>, vector<160x64xbf16>
    %cst_40 = arith.constant dense<0.000000e+00> : vector<16x64xf32>
    %45 = tpu.matmul %43, %44, %cst_40 {dimension_numbers = #tpu.dot_dimension_numbers<[1], [0], [0], [1], [0, 0, 1, 1], [], []>} : vector<16x160xbf16>, vector<160x64xbf16>, vector<16x64xf32> -> vector<16x64xf32>
    %c0_41 = arith.constant 0 : index
    %c0_42 = arith.constant 0 : index
    %46 = vector.load %arg5[%c0_41, %c0_42] : memref<1x64xf32, #tpu.memory_space<vmem>>, vector<1x64xf32>
    %47 = vector.broadcast %46 : vector<1x64xf32> to vector<16x64xf32>
    %48 = arith.addf %45, %47 : vector<16x64xf32>
    %cst_43 = arith.constant 0.000000e+00 : f32
    %49 = vector.broadcast %cst_43 : f32 to vector<16x64xf32>
    %50 = arith.maximumf %48, %49 : vector<16x64xf32>
    %cst_44 = arith.constant 0.000000e+00 : f32
    %51 = vector.broadcast %cst_44 : f32 to vector<8x64xf32>
    %c0_45 = arith.constant 0 : index
    %c0_46 = arith.constant 0 : index
    %52 = vector.load %arg12[%c0_45, %c0_46] : memref<32x64xf32, #tpu.memory_space<vmem>>, vector<8x64xf32>
    tpu.vector_store %arg12[%c0_45, %c0_46], %51 {strides = array<i32>} : memref<32x64xf32, #tpu.memory_space<vmem>>, vector<8x64xf32>,
    %c8_47 = arith.constant 8 : index
    %c0_48 = arith.constant 0 : index
    %53 = vector.load %arg12[%c8_47, %c0_48] : memref<32x64xf32, #tpu.memory_space<vmem>>, vector<16x64xf32>
    tpu.vector_store %arg12[%c8_47, %c0_48], %50 {strides = array<i32>} : memref<32x64xf32, #tpu.memory_space<vmem>>, vector<16x64xf32>,
    %c24 = arith.constant 24 : index
    %c0_49 = arith.constant 0 : index
    %54 = vector.load %arg12[%c24, %c0_49] : memref<32x64xf32, #tpu.memory_space<vmem>>, vector<8x64xf32>
    tpu.vector_store %arg12[%c24, %c0_49], %51 {strides = array<i32>} : memref<32x64xf32, #tpu.memory_space<vmem>>, vector<8x64xf32>,
    %c6_50 = arith.constant 6 : index
    %c0_51 = arith.constant 0 : index
    %55 = tpu.strided_load %arg12[%c6_50, %c0_51] {strides = array<i32: 2, 1>} : memref<32x64xf32, #tpu.memory_space<vmem>>, vector<8x64xf32>
    %c7_52 = arith.constant 7 : index
    %c0_53 = arith.constant 0 : index
    %56 = tpu.strided_load %arg12[%c7_52, %c0_53] {strides = array<i32: 2, 1>} : memref<32x64xf32, #tpu.memory_space<vmem>>, vector<8x64xf32>
    %57 = arith.maximumf %55, %56 : vector<8x64xf32>
    %c8_54 = arith.constant 8 : index
    %c0_55 = arith.constant 0 : index
    %58 = tpu.strided_load %arg12[%c8_54, %c0_55] {strides = array<i32: 2, 1>} : memref<32x64xf32, #tpu.memory_space<vmem>>, vector<8x64xf32>
    %c9_56 = arith.constant 9 : index
    %c0_57 = arith.constant 0 : index
    %59 = tpu.strided_load %arg12[%c9_56, %c0_57] {strides = array<i32: 2, 1>} : memref<32x64xf32, #tpu.memory_space<vmem>>, vector<8x64xf32>
    %60 = arith.maximumf %58, %59 : vector<8x64xf32>
    %c10_58 = arith.constant 10 : index
    %c0_59 = arith.constant 0 : index
    %61 = tpu.strided_load %arg12[%c10_58, %c0_59] {strides = array<i32: 2, 1>} : memref<32x64xf32, #tpu.memory_space<vmem>>, vector<8x64xf32>
    %c11_60 = arith.constant 11 : index
    %c0_61 = arith.constant 0 : index
    %62 = tpu.strided_load %arg12[%c11_60, %c0_61] {strides = array<i32: 2, 1>} : memref<32x64xf32, #tpu.memory_space<vmem>>, vector<8x64xf32>
    %63 = arith.maximumf %61, %62 : vector<8x64xf32>
    %64 = tpu.concatenate %57, %60, %63 in 1 : vector<8x64xf32>, vector<8x64xf32>, vector<8x64xf32> -> vector<8x192xf32>
    %65 = arith.truncf %64 : vector<8x192xf32> to vector<8x192xbf16>
    %c0_62 = arith.constant 0 : index
    %c0_63 = arith.constant 0 : index
    %66 = vector.load %arg6[%c0_62, %c0_63] : memref<192x128xbf16, #tpu.memory_space<vmem>>, vector<192x128xbf16>
    %cst_64 = arith.constant dense<0.000000e+00> : vector<8x128xf32>
    %67 = tpu.matmul %65, %66, %cst_64 {dimension_numbers = #tpu.dot_dimension_numbers<[1], [0], [0], [1], [0, 0, 1, 1], [], []>} : vector<8x192xbf16>, vector<192x128xbf16>, vector<8x128xf32> -> vector<8x128xf32>
    %c0_65 = arith.constant 0 : index
    %c0_66 = arith.constant 0 : index
    %68 = vector.load %arg7[%c0_65, %c0_66] : memref<1x128xf32, #tpu.memory_space<vmem>>, vector<1x128xf32>
    %69 = vector.broadcast %68 : vector<1x128xf32> to vector<8x128xf32>
    %70 = arith.addf %67, %69 : vector<8x128xf32>
    %cst_67 = arith.constant 0.000000e+00 : f32
    %71 = vector.broadcast %cst_67 : f32 to vector<8x128xf32>
    %72 = arith.maximumf %70, %71 : vector<8x128xf32>
    %cst_68 = arith.constant dense<0.000000e+00> : vector<128xf32>
    %73 = vector.multi_reduction <add>, %72, %cst_68 [0] : vector<8x128xf32> to vector<128xf32>
    %74 = vector.shape_cast %73 : vector<128xf32> to vector<1x128xf32>
    %cst_69 = arith.constant 8.000000e+00 : f32
    %75 = vector.broadcast %cst_69 : f32 to vector<1x128xf32>
    %76 = arith.divf %74, %75 : vector<1x128xf32>
    %c0_70 = arith.constant 0 : index
    %c0_71 = arith.constant 0 : index
    %77 = vector.load %arg8[%c0_70, %c0_71] : memref<128x128xf32, #tpu.memory_space<vmem>>, vector<128x128xf32>
    %cst_72 = arith.constant dense<0.000000e+00> : vector<1x128xf32>
    %78 = tpu.matmul %76, %77, %cst_72 {dimension_numbers = #tpu.dot_dimension_numbers<[1], [0], [0], [1], [0, 0, 1, 1], [], []>} : vector<1x128xf32>, vector<128x128xf32>, vector<1x128xf32> -> vector<1x128xf32>
    %c0_73 = arith.constant 0 : index
    %c0_74 = arith.constant 0 : index
    %79 = vector.load %arg9[%c0_73, %c0_74] : memref<1x128xf32, #tpu.memory_space<vmem>>, vector<1x128xf32>
    %80 = arith.addf %78, %79 : vector<1x128xf32>
    %c0_75 = arith.constant 0 : index
    %c0_76 = arith.constant 0 : index
    %c0_77 = arith.constant 0 : index
    %81 = vector.load %arg10[%c0_75, %c0_76, %c0_77] : memref<1x1x128xf32, #tpu.memory_space<vmem>>, vector<1x1x128xf32>
    %82 = vector.shape_cast %81 : vector<1x1x128xf32> to vector<1x128xf32>
    %83 = vector.shape_cast %80 : vector<1x128xf32> to vector<1x1x128xf32>
    tpu.vector_store %arg10[%c0_75, %c0_76, %c0_77], %83 {strides = array<i32>} : memref<1x1x128xf32, #tpu.memory_space<vmem>>, vector<1x1x128xf32>,
    return
  }
  func.func @transform_0(%arg0: i32) -> (i32, i32, i32) {
    %c0_i32 = arith.constant 0 : i32
    %c0_i32_0 = arith.constant 0 : i32
    %c0_i32_1 = arith.constant 0 : i32
    return %arg0, %c0_i32, %c0_i32_0 : i32, i32, i32
  }
  func.func @transform_1(%arg0: i32) -> (i32, i32) {
    %c0_i32 = arith.constant 0 : i32
    %c0_i32_0 = arith.constant 0 : i32
    %c0_i32_1 = arith.constant 0 : i32
    return %c0_i32, %c0_i32_0 : i32, i32
  }
  func.func @transform_2(%arg0: i32) -> (i32, i32) {
    %c0_i32 = arith.constant 0 : i32
    %c0_i32_0 = arith.constant 0 : i32
    %c0_i32_1 = arith.constant 0 : i32
    return %c0_i32, %c0_i32_0 : i32, i32
  }
  func.func @transform_3(%arg0: i32) -> (i32, i32) {
    %c0_i32 = arith.constant 0 : i32
    %c0_i32_0 = arith.constant 0 : i32
    %c0_i32_1 = arith.constant 0 : i32
    return %c0_i32, %c0_i32_0 : i32, i32
  }
  func.func @transform_4(%arg0: i32) -> (i32, i32) {
    %c0_i32 = arith.constant 0 : i32
    %c0_i32_0 = arith.constant 0 : i32
    %c0_i32_1 = arith.constant 0 : i32
    return %c0_i32, %c0_i32_0 : i32, i32
  }
  func.func @transform_5(%arg0: i32) -> (i32, i32) {
    %c0_i32 = arith.constant 0 : i32
    %c0_i32_0 = arith.constant 0 : i32
    %c0_i32_1 = arith.constant 0 : i32
    return %c0_i32, %c0_i32_0 : i32, i32
  }
  func.func @transform_6(%arg0: i32) -> (i32, i32) {
    %c0_i32 = arith.constant 0 : i32
    %c0_i32_0 = arith.constant 0 : i32
    %c0_i32_1 = arith.constant 0 : i32
    return %c0_i32, %c0_i32_0 : i32, i32
  }
  func.func @transform_7(%arg0: i32) -> (i32, i32) {
    %c0_i32 = arith.constant 0 : i32
    %c0_i32_0 = arith.constant 0 : i32
    %c0_i32_1 = arith.constant 0 : i32
    return %c0_i32, %c0_i32_0 : i32, i32
  }
  func.func @transform_8(%arg0: i32) -> (i32, i32) {
    %c0_i32 = arith.constant 0 : i32
    %c0_i32_0 = arith.constant 0 : i32
    %c0_i32_1 = arith.constant 0 : i32
    return %c0_i32, %c0_i32_0 : i32, i32
  }
  func.func @transform_9(%arg0: i32) -> (i32, i32, i32) {
    %c0_i32 = arith.constant 0 : i32
    %c0_i32_0 = arith.constant 0 : i32
    %c0_i32_1 = arith.constant 0 : i32
    return %arg0, %c0_i32, %c0_i32_0 : i32, i32, i32
  }
}

</mosaic_0001>

<bundles_post_ra>
// kernel: tpu_custom_call.1
= control target key start
LH: loop header
LB: loop body
LE: loop exit
PB: predicated region body
PF: predicated region fallthrough
CT: control target
= control target key end

     0   :  { %14 = vsyncpa [#allocation5], 0  ;;  %s2526_s0 = inlined_call_operand.vmem [shape: f32[2,134,64], index: 0, kind: input, shape index: {}]   ;;  %s2527_s1 = inlined_call_operand.vmem [shape: bf16[448,32], index: 1, kind: input, shape index: {}]   ;;  %s2528_s2 = inlined_call_operand.vmem [shape: f32[1,32], index: 2, kind: input, shape index: {}]   ;;  %s2529_s3 = inlined_call_operand.vmem [shape: bf16[160,64], index: 3, kind: input, shape index: {}]   ;;  %s2530_s4 = inlined_call_operand.vmem [shape: f32[1,64], index: 4, kind: input, shape index: {}]   ;;  %s2531_s5 = inlined_call_operand.vmem [shape: bf16[192,128], index: 5, kind: input, shape index: {}]   ;;  %s2532_s6 = inlined_call_operand.vmem [shape: f32[1,128], index: 6, kind: input, shape index: {}]   ;;  %s2533_s7 = inlined_call_operand.vmem [shape: f32[128,128], index: 7, kind: input, shape index: {}]   ;;  %s2534_s8 = inlined_call_operand.vmem [shape: f32[1,128], index: 8, kind: input, shape index: {}]   ;;  %s2535_s9 = inlined_call_operand.hbm [shape: f32[2,1,128], index: 9, kind: output, shape index: {}]  }
   0x1   :  { %16 = vsyncpa [#allocation5 + $0x1], 0  ;;  %s2056_s30 = smov 0   ;;  %s2058_s10 = smov 0  }
   0x2   :  { %s2060_s11 = smov 0   ;;  %s2062_s12 = smov 0  }
   0x3 LB: > { %s2077_s13 = sadd.s32 4294967295, %s1996_s12   ;;  %s1524_s14 = sadd.s32 4294967294, %s1996_s12   ;;  %s1996_s12 = sphi %s2062_s12, %s2541_s12   ;;  %s1992_s11 = sphi %s2060_s11, %s2540_s11   ;;  %s1988_s10 = sphi %s2058_s10, %s2539_s10   ;;  %s1984_s30 = sphi %s2056_s30, %s2538_s30  }
   0x4   : > { %s2081_s15 = sadd.s32 1, %s1996_s12   ;;  %s223_s16 = sadd.s32 1, %s1992_s11 }
   0x5   : > { %s220_s17 = ssub.s32 %s1996_s12, %s2081_s15  ;;  %p233_p0 = scmp.ne.s32.totalorder %s1992_s11, %s1988_s10 }
   0x6   : > { %p221_p1 = scmp.eq.s32.totalorder %s220_s17, 0  ;;  %p234_p2 = scmp.eq.s32.totalorder %s2077_s13, 1 }
   0x7   : > { %p239_p3 = scmp.ne.s32.totalorder %s1988_s10, %s1984_s30  ;;  %p240_p4 = scmp.eq.s32.totalorder %s1524_s14, 1 }
   0x8   : > { %s2092_s18 = scalar_select %p221_p1, %s1992_s11, %s223_s16  }
   0x9   : > { %p2094_p5 = por %p234_p2, %p233_p0  ;;  %p2098_p6 = por %p240_p4, %p239_p3 }
   0xa   : > { %p1527_p7 = scmp.ge.s32.totalorder %s1996_s12, 1  ;;  %p290_p8 = scmp.lt.s32.totalorder %s1996_s12, 3 }
   0xc   : > { %p291_p9 = pnand %p1527_p7, %p290_p8 }
   0xd   : > { %p325_p10 = scmp.lt.s32.totalorder (!%p291_p9), %s2077_s13, 1  ;;  %v1884_v0 = vld [vmem:[%s2527_s1 + $0x80] sm:$0xff] (!%p291_p9)   ;;  %v1998_v1 = vmov (!%p291_p9), 0   ;;  %v1885_v2 = vld [vmem:[%s2527_s1 + $0x88] sm:$0xff] (!%p291_p9)   ;;  %v1886_v3 = vld [vmem:[%s2527_s1 + $0x90] sm:$0xff] (!%p291_p9)   ;;  %s1999_s24 = smov (!%p291_p9), 64  }
   0xe   : > { %294 = sbr.rel (%p291_p9) target bundleno = 1341 (0x53d), region = 56  ;;  %887 = vmatprep.subr.bf16.mxu1 (!%p291_p9), %v1998_v1  ;;  %v1888_v4 = vld [vmem:[%s2527_s1 + $0x40] sm:$0xff] (!%p291_p9)   ;;  %v1887_v17 = vld [vmem:[%s2527_s1 + $0x98] sm:$0xff] (!%p291_p9)   ;;  %v1891_v30 = vld [vmem:[%s2527_s1 + $0x48] sm:$0xff] (!%p291_p9)   ;;  %vm538_vm0 = vcmask (!%p291_p9), 523264   ;;  %vm960_vm1 = vcmask (!%p291_p9), 261120  }
   0xf   : > { %888 = vmatpush1.bf16.msra.mxu1 (!%p291_p9), %v1884_v0  ;;  %v1889_v5 = vld [vmem:[%s2527_s1] sm:$0xff] (!%p291_p9)   ;;  %1646 = vmatprep.subr.bf16.mxu0 (!%p291_p9), %v1888_v4  ;;  %v1892_v33 = vld [vmem:[%s2527_s1 + $0x8] sm:$0xff] (!%p291_p9)   ;;  %v1894_v39 = vld [vmem:[%s2527_s1 + $0x50] sm:$0xff] (!%p291_p9)   ;;  %s2002_s16 = smov (!%p291_p9), 96   ;;  %vm1049_vm2 = vcmask (!%p291_p9), 785408   ;;  %vm2004_vm3 = vmmov (!%p291_p9), 0  }
  0x10   : > { %889 = vmatprep.subr.bf16.mxu1 (!%p291_p9), %v1998_v1  ;;  %1647 = vmatpush3.bf16.msra.mxu0 (!%p291_p9), %v1889_v5  ;;  %v1890_v29 = vld [vmem:[%s2527_s1 + $0xa0] sm:$0xff] (!%p291_p9)   ;;  %v1893_v37 = vld [vmem:[%s2527_s1 + $0xa8] sm:$0xff] (!%p291_p9)   ;;  %v1895_v40 = vld [vmem:[%s2527_s1 + $0x10] sm:$0xff] (!%p291_p9)   ;;  %s323_s25 = sand.u32 (!%p291_p9), 1, %s1988_s10   ;;  %s1643_s28 = sshll.u32 (!%p291_p9), %s2077_s13, 4 }
  0x11   : > { %1648 = vmatprep.subr.bf16.mxu0 (!%p291_p9), %v1891_v30  ;;  %v1896_v43 = vld [vmem:[%s2527_s1 + $0xb0] sm:$0xff] (!%p291_p9)   ;;  %v1897_v46 = vld [vmem:[%s2527_s1 + $0x58] sm:$0xff] (!%p291_p9)   ;;  %v1900_v50 = vld [vmem:[%s2527_s1 + $0x60] sm:$0xff] (!%p291_p9)   ;;  %s324_s29 = scalar_lea.vmem (!%p291_p9), [#allocation4], %s323_s25  ;;  %s1457_s17 = scalar_lea.sflag (!%p291_p9), [#allocation5], %s323_s25 }
  0x12   : > { %v1898_v49 = vld [vmem:[%s2527_s1 + $0x18] sm:$0xff] (!%p291_p9)   ;;  %v1901_v54 = vld [vmem:[%s2527_s1 + $0x20] sm:$0xff] (!%p291_p9)   ;;  %v1903_v55 = vld [vmem:[%s2527_s1 + $0x68] sm:$0xff] (!%p291_p9)   ;;  %s1469_s14 = sshll.u32 (!%p291_p9), %s324_s29, 4  ;;  %s2486_s14 = int_to_ptr.vmem [resolvable:$true] %s1469_s14 }
  0x13   : > { %890 = vmatpush1.bf16.msra.mxu1 (!%p291_p9), %v1885_v2  ;;  %v1899_v52 = vld [vmem:[%s2527_s1 + $0xb8] sm:$0xff] (!%p291_p9)   ;;  %v1902_v56 = vld [vmem:[%s2527_s1 + $0xc0] sm:$0xff] (!%p291_p9)   ;;  %v1904_v57 = vld [vmem:[%s2527_s1 + $0x28] sm:$0xff] (!%p291_p9)   ;;  %s1934_s22 = scalar_lea.vmem (!%p291_p9), %s2486_s14, 16 }
  0x14   : > { %891 = vmatprep.subr.bf16.mxu1 (!%p291_p9), %v1998_v1  ;;  %1649 = vmatpush3.bf16.msra.mxu0 (!%p291_p9), %v1892_v33  ;;  %v1906_v58 = vld [vmem:[%s2527_s1 + $0x70] sm:$0xff] (!%p291_p9)   ;;  %v1905_v59 = vld [vmem:[%s2527_s1 + $0xc8] sm:$0xff] (!%p291_p9)   ;;  %v1909_v61 = vld [vmem:[%s2527_s1 + $0x78] sm:$0xff] (!%p291_p9)   ;;  %p1935_p11 = scmp.ne.s32.totalorder (!%p291_p9), %s2486_s14, %s1934_s22 }
  0x15   : > { %s326_s23 = scalar_select %p325_p10, %s2077_s13, 1  ;;  %1650 = vmatprep.subr.bf16.mxu0 %v1894_v39  ;;  %v1907_v60 = vld [vmem:[%s2527_s1 + $0x30] sm:$0xff]   ;;  %v1911_v4 = vld [vmem:[%s2527_s1 + $0xd8] sm:$0xff]  }
  0x16   : > { %v1908_v0 = vld [vmem:[%s2527_s1 + $0xd0] sm:$0xff]   ;;  %p1936_p12 = pnand %p1935_p11, %p2094_p5  ;;  %s2005_s13 = smov [#allocation4]  }
  0x17   : > { %s1762_s26 = smul.u32 136, %s326_s23  ;;  %892 = vmatpush1.bf16.msra.mxu1 %v1886_v3  ;;  %v1910_v3 = vld [vmem:[%s2527_s1 + $0x38] sm:$0xff]   ;;  %s1938_s23 = sshll.u32 %s2005_s13, 4  ;;  %s1939_s23 = int_to_ptr.vmem [resolvable:$false] %s1938_s23 }
  0x18   : > { %893 = vmatprep.subr.bf16.mxu1 %v1998_v1  ;;  %1651 = vmatpush3.bf16.msra.mxu0 %v1895_v40  ;;  %p1937_p13 = pneg %p1936_p12  ;;  %p1941_p0 = scmp.lt.s32.totalorder %s2486_s14, %s1939_s23 }
  0x19   : > { %s2123_s21 = scalar_lea.vmem %s2526_s0, %s1762_s26  ;;  %1652 = vmatprep.subr.bf16.mxu0 %v1897_v46  ;;  %s1940_s26 = scalar_lea.vmem %s1939_s23, 32 }
  0x1a   : > { %v1552_v6 = vld [vmem:[%s2123_s21 + $0x3] ss:$2 sm:$0xff]  ;;  %v1553_v7 = vld [vmem:[%s2123_s21 + $0x13] ss:$2 sm:$0xff]  ;;  %v1576_v62 = vld [vmem:[%s2123_s21 + $0x6] ss:$2 sm:$0xff]  ;;  %p1942_p1 = scmp.lt.s32.totalorder %s1940_s26, %s1934_s22 }
  0x1b   : > { %v1568_v8 = vld [vmem:[%s2123_s21 + $0x5] ss:$2 sm:$0xff]  ;;  %v1809_v9 = vpack.i.bf16 %v1553_v7, %v1552_v6  ;;  %v1569_v10 = vld [vmem:[%s2123_s21 + $0x15] ss:$2 sm:$0xff]  ;;  %894 = vmatpush1.bf16.msra.mxu1 %v1887_v17  ;;  %v1577_v63 = vld [vmem:[%s2123_s21 + $0x16] ss:$2 sm:$0xff] }
  0x1c   : > { %v1536_v11 = vld [vmem:[%s2123_s21 + $0x1] ss:$2 sm:$0xff]  ;;  %v1537_v12 = vld [vmem:[%s2123_s21 + $0x11] ss:$2 sm:$0xff]  ;;  %v1819_v13 = vpack.i.bf16 %v1569_v10, %v1568_v8  ;;  %895 = vmatprep.subr.bf16.mxu1 %v1998_v1  ;;  %1653 = vmatpush3.bf16.msra.mxu0 %v1898_v49  ;;  %v566_v2 = vpack.c.bf16 %v1577_v63, %v1576_v62  ;;  %v1544_v6 = vld [vmem:[%s2123_s21 + $0x2] ss:$2 sm:$0xff]  ;;  %p1943_p2 = por %p1942_p1, %p1941_p0 }
  0x1d   : > { %v1554_v14 = vld [vmem:[%s2123_s21 + $0x23] ss:$2 sm:$0xff]  ;;  %v1555_v15 = vld [vmem:[%s2123_s21 + $0x33] ss:$2 sm:$0xff]  ;;  %1810 = vrot.lane.b32.xlu0 %v1809_v9, %s1999_s24  ;;  %v1814_v16 = vpack.i.bf16 %v1537_v12, %v1536_v11  ;;  %1654 = vmatprep.subr.bf16.mxu0 %v1900_v50  ;;  %v1545_v7 = vld [vmem:[%s2123_s21 + $0x12] ss:$2 sm:$0xff] }
  0x1e   : > { %1820 = vrot.lane.b32.xlu1 %v1819_v13, %s1999_s24  ;;  %v1824_v18 = vpack.i.bf16 %v1555_v15, %v1554_v14  ;;  %v1538_v19 = vld [vmem:[%s2123_s21 + $0x21] ss:$2 sm:$0xff]  ;;  %v1539_v20 = vld [vmem:[%s2123_s21 + $0x31] ss:$2 sm:$0xff]  ;;  %1613 = vmatprep.mubr.msk.bf16.mxu1 %vm538_vm0, %v566_v2  ;;  %v1560_v8 = vld [vmem:[%s2123_s21 + $0x4] ss:$2 sm:$0xff]  ;;  %p1944_p3 = pnand %p1943_p2, %p1937_p13 }
  0x1f   : > { %v1570_v21 = vld [vmem:[%s2123_s21 + $0x25] ss:$2 sm:$0xff]  ;;  %v1571_v22 = vld [vmem:[%s2123_s21 + $0x35] ss:$2 sm:$0xff]  ;;  %v1829_v24 = vpack.i.bf16 %v1539_v20, %v1538_v19  ;;  %896 = vmatpush1.bf16.msra.mxu1 %v1890_v29  ;;  %v1561_v12 = vld [vmem:[%s2123_s21 + $0x14] ss:$2 sm:$0xff] }
  0x20   : > { %v1556_v23 = vld [vmem:[%s2123_s21 + $0x43] ss:$2 sm:$0xff]  ;;  %v1557_v25 = vld [vmem:[%s2123_s21 + $0x53] ss:$2 sm:$0xff]  ;;  %v1834_v28 = vpack.i.bf16 %v1571_v22, %v1570_v21  ;;  %897 = vmatprep.subr.bf16.mxu1 %v1998_v1  ;;  %1655 = vmatpush3.bf16.msra.mxu0 %v1901_v54  ;;  %v1578_v13 = vld [vmem:[%s2123_s21 + $0x26] ss:$2 sm:$0xff] }
  0x21   : > { %1815 = vrot.lane.b32.xlu0 %v1814_v16, %s1999_s24  ;;  %v1540_v26 = vld [vmem:[%s2123_s21 + $0x41] ss:$2 sm:$0xff]  ;;  %v1541_v27 = vld [vmem:[%s2123_s21 + $0x51] ss:$2 sm:$0xff]  ;;  %v1839_v34 = vpack.i.bf16 %v1557_v25, %v1556_v23  ;;  %1656 = vmatprep.subr.bf16.mxu0 %v1903_v55  ;;  %v1579_v14 = vld [vmem:[%s2123_s21 + $0x36] ss:$2 sm:$0xff] }
  0x22   : > { %1825 = vrot.lane.b32.xlu1 %v1824_v18, %s1999_s24  ;;  %v1572_v31 = vld [vmem:[%s2123_s21 + $0x45] ss:$2 sm:$0xff]  ;;  %v1573_v32 = vld [vmem:[%s2123_s21 + $0x55] ss:$2 sm:$0xff]  ;;  %v1844_v38 = vpack.i.bf16 %v1541_v27, %v1540_v26  ;;  %v331_v21 = vld [vmem:[%s2123_s21] ss:$2 sm:$0xff]  ;;  %v570_v25 = vpack.c.bf16 %v1579_v14, %v1578_v13 }
  0x23   : > { %v1558_v35 = vld [vmem:[%s2123_s21 + $0x63] ss:$2 sm:$0xff]  ;;  %v1559_v36 = vld [vmem:[%s2123_s21 + $0x73] ss:$2 sm:$0xff]  ;;  %v1849_v44 = vpack.i.bf16 %v1573_v32, %v1572_v31  ;;  %898 = vmatpush1.bf16.msra.mxu1 %v1893_v37  ;;  %v1529_v22 = vld [vmem:[%s2123_s21 + $0x10] ss:$2 sm:$0xff] }
  0x24   : > { %v1542_v41 = vld [vmem:[%s2123_s21 + $0x61] ss:$2 sm:$0xff]  ;;  %v1543_v42 = vld [vmem:[%s2123_s21 + $0x71] ss:$2 sm:$0xff]  ;;  %v1854_v47 = vpack.i.bf16 %v1559_v36, %v1558_v35  ;;  %899 = vmatprep.subr.bf16.mxu1 %v1998_v1  ;;  %1657 = vmatpush3.bf16.msra.mxu0 %v1904_v57  ;;  %v1546_v30 = vld [vmem:[%s2123_s21 + $0x22] ss:$2 sm:$0xff] }
  0x25   : > { %1830 = vrot.lane.b32.xlu0 %v1829_v24, %s1999_s24  ;;  %v1574_v45 = vld [vmem:[%s2123_s21 + $0x65] ss:$2 sm:$0xff]  ;;  %v1575_v48 = vld [vmem:[%s2123_s21 + $0x75] ss:$2 sm:$0xff]  ;;  %v1859_v51 = vpack.i.bf16 %v1543_v42, %v1542_v41  ;;  %1658 = vmatprep.subr.bf16.mxu0 %v1906_v58  ;;  %v1547_v31 = vld [vmem:[%s2123_s21 + $0x32] ss:$2 sm:$0xff] }
  0x26   : > { %1835 = vrot.lane.b32.xlu1 %v1834_v28, %s1999_s24  ;;  %v1864_v53 = vpack.i.bf16 %v1575_v48, %v1574_v45  ;;  %v1530_v40 = vld [vmem:[%s2123_s21 + $0x20] ss:$2 sm:$0xff]  ;;  %v1531_v41 = vld [vmem:[%s2123_s21 + $0x30] ss:$2 sm:$0xff] }
  0x27   : > { %900 = vmatpush1.bf16.msra.mxu1 %v1896_v43  ;;  %v1562_v42 = vld [vmem:[%s2123_s21 + $0x24] ss:$2 sm:$0xff] }
  0x28   : > { %901 = vmatprep.subr.bf16.mxu1 %v1998_v1  ;;  %1659 = vmatpush3.bf16.msra.mxu0 %v1907_v60  ;;  %v1580_v48 = vld [vmem:[%s2123_s21 + $0x46] ss:$2 sm:$0xff]  ;;  %v1581_v49 = vld [vmem:[%s2123_s21 + $0x56] ss:$2 sm:$0xff] }
  0x29   : > { %1840 = vrot.lane.b32.xlu0 %v1839_v34, %s1999_s24  ;;  %1660 = vmatprep.subr.bf16.mxu0 %v1909_v61  ;;  %v1548_v57 = vld [vmem:[%s2123_s21 + $0x42] ss:$2 sm:$0xff]  ;;  %v1549_v58 = vld [vmem:[%s2123_s21 + $0x52] ss:$2 sm:$0xff] }
  0x2a   : > { %1845 = vrot.lane.b32.xlu1 %v1844_v38, %s1999_s24 }
  0x2b   : > { %902 = vmatpush1.bf16.msra.mxu1 %v1899_v52 }
  0x2c   : > { %903 = vmatprep.subr.bf16.mxu1 %v1998_v1  ;;  %1661 = vmatpush3.bf16.msra.mxu0 %v1910_v3 }
  0x2d   : > { %1850 = vrot.lane.b32.xlu0 %v1849_v44, %s1999_s24  ;;  %1144 = vmatprep.subr.bf16.mxu0 %v1998_v1 }
  0x2e   : > { %1855 = vrot.lane.b32.xlu1 %v1854_v47, %s1999_s24  ;;  %v1563_v47 = vld [vmem:[%s2123_s21 + $0x34] ss:$2 sm:$0xff] }
  0x2f   : > { %904 = vmatpush1.bf16.msra.mxu1 %v1902_v56 }
  0x30   : > { %905 = vmatprep.subr.bf16.mxu1 %v1998_v1 }
  0x31   : > { %1860 = vrot.lane.b32.xlu0 %v1859_v51, %s1999_s24 }
  0x32   : > { %1865 = vrot.lane.b32.xlu1 %v1864_v53, %s1999_s24 }
  0x33   : > { %906 = vmatpush1.bf16.msra.mxu1 %v1905_v59  ;;  %v574_v59 = vpack.c.bf16 %v1581_v49, %v1580_v48  ;;  %v1912_v48 = vld [vmem:[%s2529_s3] sm:$0xff]   ;;  %v1913_v49 = vld [vmem:[%s2529_s3 + $0x8] sm:$0xff]  }
  0x34   : > { %907 = vmatprep.subr.bf16.mxu1 %v1998_v1 }
  0x37   : > { %908 = vmatpush1.bf16.msra.mxu1 %v1908_v0 }
  0x38   : > { %909 = vmatprep.subr.bf16.mxu1 %v1998_v1 }
  0x3b   : > { %910 = vmatpush1.bf16.msra.mxu1 %v1911_v4 }
  0x3c   : > { %1319 = vmatprep.subr.bf16.mxu1 %v1998_v1 }
  0x8f   : > { %v1811_v5 = vpop.permute.xlu0 %1810 }
  0x90   : > { %v1813_v9 = vunpack.i.h.bf16 %v1811_v5  ;;  %v1812_v10 = vunpack.i.l.bf16 %v1811_v5  ;;  %v1821_v11 = vpop.permute.xlu1 %1820 }
  0x91   : > { %v1823_v15 = vunpack.i.h.bf16 %v1821_v11  ;;  %v1822_v16 = vunpack.i.l.bf16 %v1821_v11  ;;  %v1565_v11 = vld [vmem:[%s2123_s21 + $0x54] ss:$2 sm:$0xff] }
  0x92   : > { %v547_v17 = vsel %vm538_vm0, %v1544_v6, %v1812_v10  ;;  %v548_v18 = vsel %vm538_vm0, %v1545_v7, %v1813_v9  ;;  %v1532_v6 = vld [vmem:[%s2123_s21 + $0x40] ss:$2 sm:$0xff]  ;;  %v1533_v7 = vld [vmem:[%s2123_s21 + $0x50] ss:$2 sm:$0xff] }
  0x93   : > { %v1816_v19 = vpop.permute.xlu0 %1815  ;;  %v564_v20 = vpack.c.bf16 %v548_v18, %v547_v17  ;;  %v555_v23 = vsel %vm538_vm0, %v1560_v8, %v1822_v16  ;;  %v556_v24 = vsel %vm538_vm0, %v1561_v12, %v1823_v15  ;;  %v1564_v10 = vld [vmem:[%s2123_s21 + $0x44] ss:$2 sm:$0xff] }
  0x94   : > { %v1818_v26 = vunpack.i.h.bf16 %v1816_v19  ;;  %v1817_v27 = vunpack.i.l.bf16 %v1816_v19  ;;  %v1826_v28 = vpop.permute.xlu1 %1825  ;;  %v565_v29 = vpack.c.bf16 %v556_v24, %v555_v23  ;;  %v1550_v12 = vld [vmem:[%s2123_s21 + $0x62] ss:$2 sm:$0xff]  ;;  %v1551_v16 = vld [vmem:[%s2123_s21 + $0x72] ss:$2 sm:$0xff] }
  0x95   : > { %854 = vmatprep.mubr.bf16.mxu0 %v564_v20  ;;  %v1828_v32 = vunpack.i.h.bf16 %v1826_v28  ;;  %v1827_v33 = vunpack.i.l.bf16 %v1826_v28  ;;  %v1582_v17 = vld [vmem:[%s2123_s21 + $0x66] ss:$2 sm:$0xff]  ;;  %v1583_v18 = vld [vmem:[%s2123_s21 + $0x76] ss:$2 sm:$0xff] }
  0x96   : > { %v539_v34 = vsel %vm538_vm0, %v331_v21, %v1817_v27  ;;  %v540_v35 = vsel %vm538_vm0, %v1529_v22, %v1818_v26  ;;  %920 = vmatmul.mubr.bf16.vlgmr.msra.gmra.mrb[0].mxu1 %v565_v29  ;;  %v578_v29 = vpack.c.bf16 %v1583_v18, %v1582_v17 }
  0x97   : > { %v563_v36 = vpack.c.bf16 %v540_v35, %v539_v34  ;;  %v1831_v37 = vpop.permute.xlu0 %1830  ;;  %v549_v38 = vsel %vm538_vm0, %v1546_v30, %v1827_v33  ;;  %v550_v39 = vsel %vm538_vm0, %v1547_v31, %v1828_v32  ;;  %1614 = vmatprep.mubr.msk.bf16.mxu1 %vm538_vm0, %v570_v25  ;;  %v1566_v31 = vld [vmem:[%s2123_s21 + $0x64] ss:$2 sm:$0xff]  ;;  %v1567_v32 = vld [vmem:[%s2123_s21 + $0x74] ss:$2 sm:$0xff] }
  0x98   : > { %v1833_v43 = vunpack.i.h.bf16 %v1831_v37  ;;  %v1832_v44 = vunpack.i.l.bf16 %v1831_v37  ;;  %v1836_v45 = vpop.permute.xlu1 %1835  ;;  %v568_v46 = vpack.c.bf16 %v550_v39, %v549_v38  ;;  %v1534_v39 = vld [vmem:[%s2123_s21 + $0x60] ss:$2 sm:$0xff] }
  0x99   : > { %855 = vmatmul.mubr.bf16.vlgmr.msra.gmra.mrb[0].mxu0 %v563_v36  ;;  %v1838_v50 = vunpack.i.h.bf16 %v1836_v45  ;;  %v1837_v51 = vunpack.i.l.bf16 %v1836_v45 }
  0x9a   : > { %862 = vmatprep.mubr.bf16.mxu0 %v568_v46  ;;  %v541_v52 = vsel %vm538_vm0, %v1530_v40, %v1832_v44  ;;  %v542_v53 = vsel %vm538_vm0, %v1531_v41, %v1833_v43  ;;  %v1535_v40 = vld [vmem:[%s2123_s21 + $0x70] ss:$2 sm:$0xff]  ;;  %1145 = vmatpush1.bf16.msra.mxu0 %v1912_v48  ;;  %s2001_s21 = smov 32  }
  0x9b   : > { %v1841_v54 = vpop.permute.xlu0 %1840  ;;  %v557_v55 = vsel %vm538_vm0, %v1562_v42, %v1837_v51  ;;  %v558_v56 = vsel %vm538_vm0, %v1563_v47, %v1838_v50  ;;  %v567_v0 = vpack.c.bf16 %v542_v53, %v541_v52  ;;  %v2000_v47 = vmov 0.0   ;;  %1146 = vmatprep.subr.bf16.mxu0 %v1998_v1  ;;  %v1914_v50 = vld [vmem:[%s2529_s3 + $0x10] sm:$0xff]   ;;  %v1915_v51 = vld [vmem:[%s2529_s3 + $0x18] sm:$0xff]   ;;  %v1916_v52 = vld [vmem:[%s2529_s3 + $0x20] sm:$0xff]  }
  0x9c   : > { %v1843_v60 = vunpack.i.h.bf16 %v1841_v54  ;;  %v1842_v61 = vunpack.i.l.bf16 %v1841_v54  ;;  %v569_v62 = vpack.c.bf16 %v558_v56, %v557_v55  ;;  %v1846_v63 = vpop.permute.xlu1 %1845  ;;  %970 = vst.msk [vmem:[#allocation2 + $0x48] sm:$0xff] %vm960_vm1, %v2000_v47  ;;  %961 = vst.msk [vmem:[#allocation2] sm:$0xff] %vm960_vm1, %v2000_v47  ;;  %v1917_v53 = vld [vmem:[%s2529_s3 + $0x28] sm:$0xff]   ;;  %v1918_v54 = vld [vmem:[%s2529_s3 + $0x30] sm:$0xff]  }
  0x9d   : > { %v1848_v2 = vunpack.i.h.bf16 %v1846_v63  ;;  %v1847_v3 = vunpack.i.l.bf16 %v1846_v63  ;;  %1187 = vst.msk [vmem:[#allocation3] sm:$0xff] %vm538_vm0, %v2000_v47  ;;  %1190 = vst.msk [vmem:[#allocation3 + $0x18] sm:$0xff] %vm538_vm0, %v2000_v47  ;;  %v1919_v55 = vld [vmem:[%s2529_s3 + $0x38] sm:$0xff]  }
  0x9e   : > { %928 = vmatmul.mubr.bf16.gmra.mrb[4].mxu1 %v569_v62  ;;  %v551_v4 = vsel %vm538_vm0, %v1548_v57, %v1842_v61  ;;  %v552_v5 = vsel %vm538_vm0, %v1549_v58, %v1843_v60  ;;  %1147 = vmatpush1.bf16.msra.mxu0 %v1913_v49  ;;  %v1584_v61 = vld [vmem:[%s2528_s2] ss:$0 sm:$0xff] }
  0x9f   : > { %v1851_v8 = vpop.permute.xlu0 %1850  ;;  %v572_v9 = vpack.c.bf16 %v552_v5, %v551_v4  ;;  %1615 = vmatprep.mubr.msk.bf16.mxu1 %vm538_vm0, %v574_v59  ;;  %v543_v21 = vsel %vm538_vm0, %v1532_v6, %v1847_v3  ;;  %v544_v22 = vsel %vm538_vm0, %v1533_v7, %v1848_v2  ;;  %1148 = vmatprep.subr.bf16.mxu0 %v1998_v1 }
  0xa0   : > { %v1853_v13 = vunpack.i.h.bf16 %v1851_v8  ;;  %v1852_v14 = vunpack.i.l.bf16 %v1851_v8  ;;  %v1856_v15 = vpop.permute.xlu1 %1855  ;;  %v571_v33 = vpack.c.bf16 %v544_v22, %v543_v21 }
  0xa1   : > { %863 = vmatmul.mubr.bf16.gmra.mrb[4].mxu0 %v567_v0  ;;  %v1858_v19 = vunpack.i.h.bf16 %v1856_v15  ;;  %v1857_v20 = vunpack.i.l.bf16 %v1856_v15 }
  0xa2   : > { %870 = vmatprep.mubr.bf16.mxu0 %v572_v9  ;;  %v559_v23 = vsel %vm538_vm0, %v1564_v10, %v1852_v14  ;;  %v560_v24 = vsel %vm538_vm0, %v1565_v11, %v1853_v13  ;;  %1149 = vmatpush1.bf16.msra.mxu0 %v1914_v50 }
  0xa3   : > { %v573_v25 = vpack.c.bf16 %v560_v24, %v559_v23  ;;  %v1861_v26 = vpop.permute.xlu0 %1860  ;;  %v553_v27 = vsel %vm538_vm0, %v1550_v12, %v1857_v20  ;;  %v554_v28 = vsel %vm538_vm0, %v1551_v16, %v1858_v19  ;;  %1150 = vmatprep.subr.bf16.mxu0 %v1998_v1 }
  0xa4   : > { %v1866_v30 = vpop.permute.xlu1 %1865  ;;  %v1863_v36 = vunpack.i.h.bf16 %v1861_v26  ;;  %v1862_v37 = vunpack.i.l.bf16 %v1861_v26  ;;  %v576_v38 = vpack.c.bf16 %v554_v28, %v553_v27 }
  0xa5   : > { %v1868_v34 = vunpack.i.h.bf16 %v1866_v30  ;;  %v1867_v35 = vunpack.i.l.bf16 %v1866_v30 }
  0xa6   : > { %936 = vmatmul.mubr.bf16.gmra.mrb[8].mxu1 %v573_v25  ;;  %v545_v43 = vsel %vm538_vm0, %v1534_v39, %v1862_v37  ;;  %v546_v44 = vsel %vm538_vm0, %v1535_v40, %v1863_v36  ;;  %1151 = vmatpush1.bf16.msra.mxu0 %v1915_v51 }
  0xa7   : > { %1616 = vmatprep.mubr.msk.bf16.mxu1 %vm538_vm0, %v578_v29  ;;  %v561_v41 = vsel %vm538_vm0, %v1566_v31, %v1867_v35  ;;  %v562_v42 = vsel %vm538_vm0, %v1567_v32, %v1868_v34  ;;  %v575_v46 = vpack.c.bf16 %v546_v44, %v545_v43  ;;  %1152 = vmatprep.subr.bf16.mxu0 %v1998_v1 }
  0xa8   : > { %v577_v45 = vpack.c.bf16 %v562_v42, %v561_v41 }
  0xa9   : > { %871 = vmatmul.mubr.bf16.gmra.mrb[8].mxu0 %v571_v33 }
  0xaa   : > { %878 = vmatprep.mubr.bf16.mxu0 %v576_v38  ;;  %1153 = vmatpush1.bf16.msra.mxu0 %v1916_v52 }
  0xab   : > { %1154 = vmatprep.subr.bf16.mxu0 %v1998_v1 }
  0xae   : > { %944 = vmatmul.mubr.bf16.gmra.mrb[12].mxu1 %v577_v45  ;;  %1155 = vmatpush1.bf16.msra.mxu0 %v1917_v53 }
  0xaf   : > { %1156 = vmatprep.subr.bf16.mxu0 %v1998_v1 }
  0xb1   : > { %879 = vmatmul.mubr.bf16.gmra.mrb[12].mxu0 %v575_v46 }
  0xb2   : > { %1157 = vmatpush1.bf16.msra.mxu0 %v1918_v54 }
  0xb3   : > { %1158 = vmatprep.subr.bf16.mxu0 %v1998_v1 }
  0xb6   : > { %1159 = vmatpush1.bf16.msra.mxu0 %v1919_v55 }
  0xb7   : > { %1160 = vmatprep.subr.bf16.mxu0 %v1998_v1 }
 0x169   : > { %v921_v56 = vpop.f32.mrb[0].mxu1 }
 0x16a   : > { %v923_v57 = vpop.f32.mrb[1].mxu1 }
 0x16b   : > { %v924_v58 = vpop.f32.mrb[2].mxu1 }
 0x16c   : > { %v1662_v59 = vpop.f32.mrb[0].mxu0  ;;  %v926_v60 = vpop.f32.mrb[3].mxu1 }
 0x16d   : > { %v1663_v62 = vpop.f32.mrb[1].mxu0 }
 0x16e   : > { %v1664_v63 = vadd.f32 %v1663_v62, %v1662_v59  ;;  %v1665_v0 = vpop.f32.mrb[2].mxu0  ;;  %v1920_v59 = vld [vmem:[%s2529_s3 + $0x40] sm:$0xff]  }
 0x16f   : > { %v1666_v2 = vpop.f32.mrb[3].mxu0  ;;  %1161 = vmatpush1.bf16.msra.mxu0 %v1920_v59  ;;  %v1932_v59 = vld [vmem:[%s2531_s5 + $0x50] sm:$0xff]  }
 0x170   : > { %v857_v3 = vadd.f32 %v1664_v63, %v1584_v61  ;;  %v1667_v4 = vadd.f32 %v1666_v2, %v1665_v0  ;;  %1162 = vmatprep.subr.bf16.mxu0 %v1998_v1 }
 0x171   : > { %v929_v5 = vpop.f32.mrb[4].mxu1 }
 0x172   : > { %v922_v6 = vadd.f32 %v921_v56, %v857_v3  ;;  %v860_v7 = vadd.f32 %v1667_v4, %v1584_v61  ;;  %v931_v8 = vpop.f32.mrb[5].mxu1  ;;  %v1921_v3 = vld [vmem:[%s2529_s3 + $0x48] sm:$0xff]  }
 0x173   : > { %v932_v9 = vpop.f32.mrb[6].mxu1  ;;  %1163 = vmatpush1.bf16.msra.mxu0 %v1921_v3 }
 0x174   : > { %v952_v10 = vmax.f32 %v922_v6, 0.0  ;;  %v925_v11 = vadd.f32 %v924_v58, %v860_v7  ;;  %v1668_v12 = vpop.f32.mrb[4].mxu0  ;;  %v934_v13 = vpop.f32.mrb[7].mxu1 }
 0x175   : > { %v1669_v14 = vpop.f32.mrb[5].mxu0 }
 0x176   : > { %962 = vst.msk [vmem:[#allocation2 + $0x8] sm:$0xff] %vm960_vm1, %v952_v10  ;;  %v953_v15 = vmax.f32 %v925_v11, 0.0  ;;  %v1670_v16 = vadd.f32 %v1669_v14, %v1668_v12  ;;  %v1671_v17 = vpop.f32.mrb[6].mxu0 }
 0x177   : > { %v1672_v18 = vpop.f32.mrb[7].mxu0 }
 0x178   : > { %963 = vst.msk [vmem:[#allocation2 + $0x10] sm:$0xff] %vm960_vm1, %v953_v15  ;;  %v865_v19 = vadd.f32 %v1670_v16, %v1584_v61  ;;  %v1673_v20 = vadd.f32 %v1672_v18, %v1671_v17 }
 0x179   : > { %v937_v21 = vpop.f32.mrb[8].mxu1 }
 0x17a   : > { %v930_v22 = vadd.f32 %v929_v5, %v865_v19  ;;  %v868_v23 = vadd.f32 %v1673_v20, %v1584_v61  ;;  %v939_v24 = vpop.f32.mrb[9].mxu1 }
 0x17b   : > { %v940_v25 = vpop.f32.mrb[10].mxu1 }
 0x17c   : > { %v954_v26 = vmax.f32 %v930_v22, 0.0  ;;  %v933_v27 = vadd.f32 %v932_v9, %v868_v23  ;;  %v1674_v28 = vpop.f32.mrb[8].mxu0  ;;  %v942_v29 = vpop.f32.mrb[11].mxu1 }
 0x17d   : > { %v1675_v30 = vpop.f32.mrb[9].mxu0 }
 0x17e   : > { %964 = vst.msk [vmem:[#allocation2 + $0x18] sm:$0xff] %vm960_vm1, %v954_v26  ;;  %v955_v31 = vmax.f32 %v933_v27, 0.0  ;;  %v1676_v32 = vadd.f32 %v1675_v30, %v1674_v28  ;;  %v1677_v33 = vpop.f32.mrb[10].mxu0 }
 0x17f   : > { %v1678_v34 = vpop.f32.mrb[11].mxu0 }
 0x180   : > { %965 = vst.msk [vmem:[#allocation2 + $0x20] sm:$0xff] %vm960_vm1, %v955_v31  ;;  %v873_v35 = vadd.f32 %v1676_v32, %v1584_v61  ;;  %v1679_v36 = vadd.f32 %v1678_v34, %v1677_v33 }
 0x181   : > { %v945_v37 = vpop.f32.mrb[12].mxu1 }
 0x182   : > { %v938_v38 = vadd.f32 %v937_v21, %v873_v35  ;;  %v876_v39 = vadd.f32 %v1679_v36, %v1584_v61  ;;  %v947_v40 = vpop.f32.mrb[13].mxu1 }
 0x183   : > { %v948_v41 = vpop.f32.mrb[14].mxu1 }
 0x184   : > { %v956_v42 = vmax.f32 %v938_v38, 0.0  ;;  %v941_v43 = vadd.f32 %v940_v25, %v876_v39  ;;  %v1680_v44 = vpop.f32.mrb[12].mxu0  ;;  %v950_v45 = vpop.f32.mrb[15].mxu1 }
 0x185   : > { %v1681_v46 = vpop.f32.mrb[13].mxu0 }
 0x186   : > { %966 = vst.msk [vmem:[#allocation2 + $0x28] sm:$0xff] %vm960_vm1, %v956_v42  ;;  %v957_v48 = vmax.f32 %v941_v43, 0.0  ;;  %v1682_v49 = vadd.f32 %v1681_v46, %v1680_v44  ;;  %v1683_v50 = vpop.f32.mrb[14].mxu0 }
 0x187   : > { %v1684_v51 = vpop.f32.mrb[15].mxu0  ;;  %v992_v60 = vld [vmem:[#allocation2 + $0x8] ss:$4 sm:$0xff]  ;;  %v996_v0 = vld [vmem:[#allocation2 + $0x9] ss:$4 sm:$0xff] }
 0x188   : > { %967 = vst.msk [vmem:[#allocation2 + $0x30] sm:$0xff] %vm960_vm1, %v957_v48  ;;  %v881_v52 = vadd.f32 %v1682_v49, %v1584_v61  ;;  %v1685_v53 = vadd.f32 %v1684_v51, %v1683_v50  ;;  %v982_v2 = vld [vmem:[#allocation2 + $0x6] ss:$4 sm:$0xff]  ;;  %v999_v12 = vmax.f32 %v992_v60, %v996_v0  ;;  %v1006_v20 = vld [vmem:[#allocation2 + $0xb] ss:$4 sm:$0xff] }
 0x189   : > { %v1002_v19 = vld [vmem:[#allocation2 + $0xa] ss:$4 sm:$0xff]  ;;  %v972_v26 = vld [vmem:[#allocation2 + $0x4] ss:$4 sm:$0xff]  ;;  %v976_v29 = vld [vmem:[#allocation2 + $0x5] ss:$4 sm:$0xff] }
 0x18a   : > { %v946_v54 = vadd.f32 %v945_v37, %v881_v52  ;;  %v884_v55 = vadd.f32 %v1685_v53, %v1584_v61  ;;  %v986_v61 = vld [vmem:[#allocation2 + $0x7] ss:$4 sm:$0xff]  ;;  %v1009_v24 = vmax.f32 %v1002_v19, %v1006_v20  ;;  %v979_v35 = vmax.f32 %v972_v26, %v976_v29  ;;  %v1617_v60 = vld [vmem:[%s2530_s4] ss:$0 sm:$0xff] }
 0x18b   : > { %v989_v14 = vmax.f32 %v982_v2, %v986_v61  ;;  %v1922_v49 = vld [vmem:[%s2531_s5] sm:$0xff]   ;;  %v1923_v50 = vld [vmem:[%s2531_s5 + $0x8] sm:$0xff]   ;;  %v1924_v51 = vld [vmem:[%s2531_s5 + $0x10] sm:$0xff]  }
 0x18c   : > { %v958_v56 = vmax.f32 %v946_v54, 0.0  ;;  %v949_v57 = vadd.f32 %v948_v41, %v884_v55  ;;  %1320 = vmatpush1.bf16.msra.mxu1 %v1922_v49  ;;  %v1925_v52 = vld [vmem:[%s2531_s5 + $0x18] sm:$0xff]   ;;  %v1926_v53 = vld [vmem:[%s2531_s5 + $0x20] sm:$0xff]   ;;  %v1927_v54 = vld [vmem:[%s2531_s5 + $0x28] sm:$0xff]  }
 0x18d   : > { %v1012_v62 = vld [vmem:[#allocation2 + $0xc] ss:$4 sm:$0xff]  ;;  %v1016_v63 = vld [vmem:[#allocation2 + $0xd] ss:$4 sm:$0xff]  ;;  %1321 = vmatprep.subr.bf16.mxu1 %v1998_v1 }
 0x18e   : > { %968 = vst.msk [vmem:[#allocation2 + $0x38] sm:$0xff] %vm960_vm1, %v958_v56  ;;  %v959_v58 = vmax.f32 %v949_v57, 0.0  ;;  %v1019_v7 = vmax.f32 %v1012_v62, %v1016_v63  ;;  %v1928_v55 = vld [vmem:[%s2531_s5 + $0x30] sm:$0xff]   ;;  %v1929_v56 = vld [vmem:[%s2531_s5 + $0x38] sm:$0xff]   ;;  %v1930_v57 = vld [vmem:[%s2531_s5 + $0x40] sm:$0xff]  }
 0x18f   : > { %v1374_v29 = vld [vmem:[%s2533_s7 + $0x30] sm:$0xff] }
 0x190   : > { %969 = vst.msk [vmem:[#allocation2 + $0x40] sm:$0xff] %vm960_vm1, %v959_v58  ;;  %1322 = vmatpush1.bf16.msra.mxu1 %v1923_v50  ;;  %v1931_v58 = vld [vmem:[%s2531_s5 + $0x48] sm:$0xff]  }
 0x191   : > { %1323 = vmatprep.subr.bf16.mxu1 %v1998_v1 }
 0x194   : > { %1324 = vmatpush1.bf16.msra.mxu1 %v1924_v51 }
 0x195   : > { %1325 = vmatprep.subr.bf16.mxu1 %v1998_v1 }
 0x197   : > { %v1014_v4 = vld [vmem:[#allocation2 + $0x2c] ss:$4 sm:$0xff]  ;;  %v1018_v5 = vld [vmem:[#allocation2 + $0x2d] ss:$4 sm:$0xff]  ;;  %v984_v10 = vld [vmem:[#allocation2 + $0x26] ss:$4 sm:$0xff] }
 0x198   : > { %v994_v6 = vld [vmem:[#allocation2 + $0x28] ss:$4 sm:$0xff]  ;;  %v1020_v8 = vmax.f32 %v1014_v4, %v1018_v5  ;;  %v998_v9 = vld [vmem:[#allocation2 + $0x29] ss:$4 sm:$0xff]  ;;  %v988_v11 = vld [vmem:[#allocation2 + $0x27] ss:$4 sm:$0xff]  ;;  %1326 = vmatpush1.bf16.msra.mxu1 %v1925_v52 }
 0x199   : > { %v1000_v13 = vmax.f32 %v994_v6, %v998_v9  ;;  %v990_v15 = vmax.f32 %v984_v10, %v988_v11  ;;  %v1004_v16 = vld [vmem:[#allocation2 + $0x2a] ss:$4 sm:$0xff]  ;;  %v1008_v17 = vld [vmem:[#allocation2 + $0x2b] ss:$4 sm:$0xff]  ;;  %v974_v27 = vld [vmem:[#allocation2 + $0x24] ss:$4 sm:$0xff]  ;;  %1327 = vmatprep.subr.bf16.mxu1 %v1998_v1 }
 0x19a   : > { %v1053_v18 = vpack.c.bf16 %v1020_v8, %v1019_v7  ;;  %v1010_v23 = vmax.f32 %v1004_v16, %v1008_v17  ;;  %v978_v28 = vld [vmem:[#allocation2 + $0x25] ss:$4 sm:$0xff]  ;;  %v2003_v9 = vmov 0.0|0.0  }
 0x19b   : > { %v1874_v21 = vpack.i.bf16 %v1000_v13, %v999_v12  ;;  %v1869_v22 = vpack.i.bf16 %v990_v15, %v989_v14  ;;  %v980_v32 = vmax.f32 %v974_v27, %v978_v28  ;;  %v1933_v5 = vld [vmem:[%s2531_s5 + $0x58] sm:$0xff]   ;;  %v1369_v7 = vld [vmem:[%s2533_s7 + $0x8] sm:$0xff]  ;;  %v1370_v8 = vld [vmem:[%s2533_s7 + $0x10] sm:$0xff]  ;;  %1738 = vmatprep.subr.bf16.mxu0 %v2003_v9 }
 0x19c   : > { %1628 = vmatprep.mubr.msk.bf16.mxu0 %vm960_vm1, %v1053_v18  ;;  %v1879_v25 = vpack.i.bf16 %v1010_v23, %v1009_v24  ;;  %1328 = vmatpush1.bf16.msra.mxu1 %v1926_v53  ;;  %v1371_v11 = vld [vmem:[%s2533_s7 + $0x18] sm:$0xff]  ;;  %v1372_v13 = vld [vmem:[%s2533_s7 + $0x20] sm:$0xff]  ;;  %v1373_v14 = vld [vmem:[%s2533_s7 + $0x28] sm:$0xff] }
 0x19d   : > { %1875 = vrot.lane.b32.xlu1 %v1874_v21, %s1999_s24  ;;  %1870 = vrot.lane.b32.xlu0 %v1869_v22, %s2001_s21  ;;  %v1742_v12 = vpack.c.bf16 %v1371_v11, %v1370_v8  ;;  %v1745_v18 = vpack.c.bf16 %v1373_v14, %v1372_v13 }
 0x19e   : > { %1329 = vmatprep.subr.bf16.mxu1 %v1998_v1 }
 0x1a0   : > { %1330 = vmatpush1.bf16.msra.mxu1 %v1927_v54 }
 0x1a1   : > { %1880 = vrot.lane.b32.xlu0 %v1879_v25, %s2002_s16  ;;  %1331 = vmatprep.subr.bf16.mxu1 %v1998_v1  ;;  %s2484_s16 = scalar_lea.hbm %s2535_s9, %s1643_s28 }
 0x1a4   : > { %1332 = vmatpush1.bf16.msra.mxu1 %v1928_v55 }
 0x1a5   : > { %1333 = vmatprep.subr.bf16.mxu1 %v1998_v1 }
 0x1a8   : > { %1334 = vmatpush1.bf16.msra.mxu1 %v1929_v56 }
 0x1a9   : > { %1335 = vmatprep.subr.bf16.mxu1 %v1998_v1 }
 0x1ac   : > { %1336 = vmatpush1.bf16.msra.mxu1 %v1930_v57 }
 0x1ad   : > { %1337 = vmatprep.subr.bf16.mxu1 %v1998_v1 }
 0x1b0   : > { %1338 = vmatpush1.bf16.msra.mxu1 %v1931_v58  ;;  %v1384_v58 = vld [vmem:[%s2534_s8] sm:$0x1] }
 0x1b1   : > { %1339 = vmatprep.subr.bf16.mxu1 %v1998_v1 }
 0x1b4   : > { %1340 = vmatpush1.bf16.msra.mxu1 %v1932_v59 }
 0x1b5   : > { %1341 = vmatprep.subr.bf16.mxu1 %v1998_v1  ;;  %v1368_v1 = vld [vmem:[%s2533_s7] sm:$0xff] }
 0x1b6   : > { %v1739_v10 = vpack.c.bf16 %v1369_v7, %v1368_v1 }
 0x1b8   : > { %1342 = vmatpush1.bf16.msra.mxu1 %v1933_v5 }
 0x20f   : > { %v1876_v30 = vpop.permute.xlu1 %1875  ;;  %v1871_v31 = vpop.permute.xlu0 %1870 }
 0x210   : > { %v1873_v33 = vunpack.i.h.bf16 %v1871_v31  ;;  %v1872_v34 = vunpack.i.l.bf16 %v1871_v31  ;;  %v1878_v36 = vunpack.i.h.bf16 %v1876_v30  ;;  %v1877_v37 = vunpack.i.l.bf16 %v1876_v30  ;;  %v1375_v30 = vld [vmem:[%s2533_s7 + $0x38] sm:$0xff] }
 0x211   : > { %v1748_v31 = vpack.c.bf16 %v1375_v30, %v1374_v29 }
 0x212   : > { %v1046_v38 = vsel %vm960_vm1, %v980_v32, %v1873_v33  ;;  %v1045_v39 = vsel %vm960_vm1, %v979_v35, %v1872_v34  ;;  %v1376_v32 = vld [vmem:[%s2533_s7 + $0x40] sm:$0xff]  ;;  %v1377_v33 = vld [vmem:[%s2533_s7 + $0x48] sm:$0xff]  ;;  %v1378_v35 = vld [vmem:[%s2533_s7 + $0x50] sm:$0xff] }
 0x213   : > { %v1881_v40 = vpop.permute.xlu0 %1880  ;;  %v1047_v43 = vsel %vm538_vm0, %v1045_v39, %v1877_v37  ;;  %v1048_v44 = vsel %vm538_vm0, %v1046_v38, %v1878_v36  ;;  %v1751_v34 = vpack.c.bf16 %v1377_v33, %v1376_v32  ;;  %v1379_v36 = vld [vmem:[%s2533_s7 + $0x58] sm:$0xff]  ;;  %v1380_v38 = vld [vmem:[%s2533_s7 + $0x60] sm:$0xff]  ;;  %v1381_v39 = vld [vmem:[%s2533_s7 + $0x68] sm:$0xff] }
 0x214   : > { %v1883_v41 = vunpack.i.h.bf16 %v1881_v40  ;;  %v1882_v42 = vunpack.i.l.bf16 %v1881_v40  ;;  %v1754_v37 = vpack.c.bf16 %v1379_v36, %v1378_v35  ;;  %v1757_v40 = vpack.c.bf16 %v1381_v39, %v1380_v38 }
 0x216   : > { %v1050_v45 = vsel %vm1049_vm2, %v1047_v43, %v1882_v42  ;;  %v1051_v46 = vsel %vm1049_vm2, %v1048_v44, %v1883_v41  ;;  %v1382_v41 = vld [vmem:[%s2533_s7 + $0x70] sm:$0xff]  ;;  %v1383_v42 = vld [vmem:[%s2533_s7 + $0x78] sm:$0xff]  ;;  %v1629_v44 = vld [vmem:[%s2532_s6] ss:$0 sm:$0xff] }
 0x217   : > { %v1052_v48 = vpack.c.bf16 %v1051_v46, %v1050_v45  ;;  %v1760_v43 = vpack.c.bf16 %v1383_v42, %v1382_v41 }
 0x219   : > { %1177 = vmatmul.mubr.bf16.vlgmr.msra.gmra.mrb[16].mxu0 %v1052_v48 }
 0x21a   : > { %1740 = vmatpush3.bf16.msra.mxu0 %v1739_v10  ;;  %1735 = vmatprep.mubr.msk.f32.mxu0 %vm2004_vm3, %v2000_v47 }
 0x21b   : > { %1741 = vmatprep.subr.bf16.mxu0 %v2003_v9 }
 0x21e   : > { %1743 = vmatpush3.bf16.msra.mxu0 %v1742_v12 }
 0x21f   : > { %1744 = vmatprep.subr.bf16.mxu0 %v2003_v9 }
 0x222   : > { %1746 = vmatpush3.bf16.msra.mxu0 %v1745_v18 }
 0x223   : > { %1747 = vmatprep.subr.bf16.mxu0 %v2003_v9 }
 0x226   : > { %1749 = vmatpush3.bf16.msra.mxu0 %v1748_v31 }
 0x227   : > { %1750 = vmatprep.subr.bf16.mxu0 %v2003_v9 }
 0x22a   : > { %1752 = vmatpush3.bf16.msra.mxu0 %v1751_v34 }
 0x22b   : > { %1753 = vmatprep.subr.bf16.mxu0 %v2003_v9 }
 0x22e   : > { %1755 = vmatpush3.bf16.msra.mxu0 %v1754_v37 }
 0x22f   : > { %1756 = vmatprep.subr.bf16.mxu0 %v2003_v9 }
 0x232   : > { %1758 = vmatpush3.bf16.msra.mxu0 %v1757_v40 }
 0x233   : > { %1759 = vmatprep.subr.bf16.mxu0 %v2003_v9 }
 0x236   : > { %1761 = vmatpush3.bf16.msra.mxu0 %v1760_v43 }
 0x2ec   : > { %v1178_v62 = vpop.f32.mrb[16].mxu0 }
 0x2ed   : > { %v1179_v63 = vadd.f32 %v1617_v60, %v1178_v62  ;;  %v1180_v0 = vpop.f32.mrb[17].mxu0 }
 0x2ee   : > { %v1181_v2 = vpop.f32.mrb[18].mxu0 }
 0x2ef   : > { %v1185_v61 = vmax.f32 %v1179_v63, 0.0  ;;  %v1182_v3 = vadd.f32 %v1617_v60, %v1181_v2  ;;  %v1183_v4 = vpop.f32.mrb[19].mxu0 }
 0x2f1   : > { %1188 = vst.msk [vmem:[#allocation3 + $0x8] sm:$0xff] %vm538_vm0, %v1185_v61  ;;  %v1186_v6 = vmax.f32 %v1182_v3, 0.0 }
 0x2f3   : > { %1189 = vst.msk [vmem:[#allocation3 + $0x10] sm:$0xff] %vm538_vm0, %v1186_v6 }
 0x2fa   : > { %v1197_v15 = vld [vmem:[#allocation3 + $0x8] ss:$2 sm:$0xff]  ;;  %v1199_v16 = vld [vmem:[#allocation3 + $0x9] ss:$2 sm:$0xff] }
 0x2fb   : > { %v1202_v17 = vld [vmem:[#allocation3 + $0xa] ss:$2 sm:$0xff]  ;;  %v1200_v19 = vmax.f32 %v1197_v15, %v1199_v16  ;;  %v1204_v20 = vld [vmem:[#allocation3 + $0xb] ss:$2 sm:$0xff] }
 0x2fc   : > { %v1205_v21 = vmax.f32 %v1202_v17, %v1204_v20  ;;  %v1192_v23 = vld [vmem:[#allocation3 + $0x6] ss:$2 sm:$0xff]  ;;  %v1194_v24 = vld [vmem:[#allocation3 + $0x7] ss:$2 sm:$0xff] }
 0x2fd   : > { %1207 = vrot.lane.b32.xlu1 %v1200_v19, %s1999_s24  ;;  %v1195_v25 = vmax.f32 %v1192_v23, %v1194_v24 }
 0x2fe   : > { %v1212_v22 = vpack.c.bf16 %v1205_v21, %v1205_v21 }
 0x300   : > { %1642 = vmatprep.mubr.msk.bf16.mxu1 %vm538_vm0, %v1212_v22 }
 0x36f   : > { %v1208_v26 = vpop.permute.xlu1 %1207 }
 0x370   : > { %v1210_v27 = vsel %vm538_vm0, %v1195_v25, %v1208_v26 }
 0x371   : > { %v1211_v28 = vpack.c.bf16 %v1210_v27, %v1210_v27 }
 0x373   : > { %1352 = vmatmul.mubr.bf16.vlgmr.msra.gmra.mrb[16].mxu1 %v1211_v28 }
 0x446   : > { %v1353_v45 = vpop.f32.mrb[16].mxu1 }
 0x447   : > { %v1354_v46 = vadd.f32 %v1629_v44, %v1353_v45  ;;  %v1355_v48 = vpop.f32.mrb[17].mxu1 }
 0x448   : > { %v1356_v49 = vpop.f32.mrb[18].mxu1 }
 0x449   : > { %v1359_v50 = vmax.f32 %v1354_v46, 0.0  ;;  %v1357_v51 = vpop.f32.mrb[19].mxu1 }
 0x44b   : > { %v1360_v52 = vrot.slane %v1359_v50, 4 }
 0x44d   : > { %v1361_v53 = vadd.f32 %v1360_v52, %v1359_v50 }
 0x44f   : > { %v1362_v54 = vrot.slane %v1361_v53, 2 }
 0x451   : > { %v1363_v55 = vadd.f32 %v1362_v54, %v1361_v53 }
 0x453   : > { %v1364_v56 = vrot.slane %v1363_v55, 1 }
 0x455   : > { %v1365_v57 = vadd.f32 %v1364_v56, %v1363_v55 }
 0x457   : > { %v1367_v47 = vmul.f32 0.125, %v1365_v57 }
 0x459   : > { %1736 = vmatmul.mubr.f32.vlgmr.msra.gmra.mrb[20].mxu0 %v1367_v47 }
 0x52c   : > { %v1451_v59 = vpop.f32.mrb[20].mxu0 }
 0x52d   : > { %v1452_v60 = vadd.f32 %v1451_v59, %v1384_v58  ;;  %v1737_v62 = vpop.f32.mrb[21].mxu0 }
 0x52f   : > { %1455 = vst [vmem:[%s324_s29] sm:$0x1] %v1452_v60 }
 0x530   : > { %1947 = shalt.err (!%p1944_p3)
}
 0x531   : > { %s1948_s25 = scalar_lea.hbm %s2484_s16, 16  ;;  %s1952_s29 = scalar_lea.hbm %s2535_s9, 32 }
 0x532   : > { %p1949_p4 = scmp.ne.s32.totalorder %s2484_s16, %s1948_s25  ;;  %p1953_p9 = scmp.lt.u32.totalorder %s2484_s16, %s2535_s9 }
 0x533   : > { %p1954_p10 = scmp.lt.u32.totalorder %s1952_s29, %s1948_s25  ;;  %p1956_p12 = scmp.lt.u32.totalorder %s1948_s25, %s2484_s16 }
 0x534   : > { %p1950_p7 = pnand %p1949_p4, %p2094_p5 }
 0x535   : > { %p1955_p11 = por %p1954_p10, %p1953_p9 }
 0x536   : > { %p1951_p8 = pneg %p1950_p7 }
 0x537   : > { %p1957_p13 = por %p1956_p12, %p1955_p11 }
 0x539   : > { %p1958_p0 = pnand %p1957_p13, %p1951_p8 }
 0x53b   : > { %1961 = shalt.err (!%p1958_p0)
}
 0x53c   : > { %1763 = dma.vmem_to_hbm [thread:$0]  (%p2094_p5), %s2486_s14, 16, %s2484_s16, %s1457_s17  }
 0x53d PF: > { %p1769_p1 = scmp.ge.s32.totalorder %s1996_s12, 2  ;;  %s1481_s22 = sand.u32 1, %s1984_s30  }
 0x53e   : > { %s1482_s13 = scalar_lea.sflag [#allocation5], %s1481_s22 }
 0x53f   : > { %p1766_p2 = pnand %p1769_p1, %p2098_p6 }
 0x541   : > { %1979 = dma.done.wait (!%p1766_p2), %s1482_s13, 16  }
 0x542   : > { %1981 = vsyncadd (!%p1766_p2), %s1482_s13, 4294967280  ;;  %p19_p3 = scmp.ge.s32.totalorder %s2081_s15, 4   ;;  %s2538_s30 = smov %s1988_s10 }
 0x543   : > { %s2539_s10 = smov %s1992_s11  ;;  %s2540_s11 = smov %s2092_s18 }
 0x544   : > { %s2541_s12 = smov %s2081_s15  ;;  %21 = sbr.rel (!%p19_p3) target bundleno = 3 (0x3), region = 172 }
 0x54b   :  { %1486 = vsyncpa [#allocation5], 1 }
 0x54c   :  { %1488 = vsyncpa [#allocation5 + $0x1], 1 }

</bundles_post_ra>
